<compile_context>
chip_gen: v6e
topology: v6e:2x2x1
jax: 0.10.0
libtpu: 0.0.40
codegen_flags: <defaults>
</compile_context>

<pallas_src>
import functools

import jax
import jax.numpy as jnp
from jax.experimental import pallas as pl
from jax.experimental.pallas import tpu as pltpu

_MIN_BLOCK_BYTES = 256 << 10   # reject pathological tiny-tile factorizations on big arrays


def _swish_kernel(x_ref, o_ref, *, compute_dtype):
    x = x_ref[...].astype(compute_dtype)
    # sigmoid(x) == 0.5 * tanh(0.5 * x) + 0.5  -> a single EUP transcendental,
    # no divide / Newton iteration on the VPU.
    sig = jnp.tanh(x * 0.5) * 0.5 + 0.5
    o_ref[...] = (x * sig).astype(o_ref.dtype)


def _device_tuning():
    """Return (target_block_bytes, min_grid_steps, f32_compute_required)."""
    kind = ""
    try:
        kind = jax.devices()[0].device_kind.lower()
    except Exception:  # pragma: no cover - be conservative if query fails
        pass
    if "v7" in kind:
        # 3.2 TB/s per TC: bigger blocks amortize the ~0.35us/step overhead;
        # two TensorCores -> prefer at least 2 grid steps. bf16 VPU/EUP OK.
        return 4 << 20, 2, False
    if "v6" in kind:
        return 4 << 20, 1, False
    # v5e / older / unknown: small scoped-VMEM default, no bf16 VPU/EUP.
    return 2 << 20, 1, True


def _largest_aligned_divisor(rows: int, target: int, granule: int) -> int:
    """Largest multiple of `granule` that divides `rows` and is <= target."""
    t = min(target, rows)
    t -= t % granule
    while t >= granule:
        if rows % t == 0:
            return t
        t -= granule
    return granule


def _exact_plan(n, itemsize, sublane_g, target_block_bytes, min_grid):
    """(rows, lanes, tile_rows) covering exactly n elements, or None."""
    total_bytes = n * itemsize
    for lanes in (4096, 2048, 1024, 512, 256, 128):
        if n % lanes:
            continue
        rows = n // lanes
        if rows % sublane_g:
            continue  # only sublane-aligned rows -> unmasked, full-width stores
        target_rows = max(
            sublane_g,
            (target_block_bytes // (lanes * itemsize)) // sublane_g * sublane_g,
        )
        tile_rows = _largest_aligned_divisor(rows, target_rows, sublane_g)
        block_bytes = tile_rows * lanes * itemsize
        if block_bytes < _MIN_BLOCK_BYTES and total_bytes > 4 * target_block_bytes:
            continue  # bad factorization for a big array; try narrower lanes
        if min_grid > 1 and rows // tile_rows < min_grid and rows % (min_grid * sublane_g) == 0:
            tile_rows = rows // min_grid  # keep every TensorCore busy on v7x
        return rows, lanes, tile_rows
    return None


def _fallback_plan(n, itemsize, sublane_g, target_block_bytes):
    """Largest aligned prefix plan for ragged n: (prefix, rows, lanes, tile_rows)."""
    lanes = 512
    target_rows = max(
        sublane_g,
        (target_block_bytes // (lanes * itemsize)) // sublane_g * sublane_g,
    )
    block_elems = lanes * target_rows
    if n >= block_elems:
        prefix = n - n % block_elems
        return prefix, prefix // lanes, lanes, target_rows
    lanes = 128
    chunk = lanes * sublane_g
    prefix = n - n % chunk
    if prefix:
        return prefix, prefix // lanes, lanes, prefix // lanes
    return 0, 0, 0, 0


def _run_pallas(x2d, rows, lanes, tile_rows, compute_dtype, out_dtype):
    grid = (rows // tile_rows,)
    return pl.pallas_call(
        functools.partial(_swish_kernel, compute_dtype=compute_dtype),
        out_shape=jax.ShapeDtypeStruct((rows, lanes), out_dtype),
        grid_spec=pltpu.PrefetchScalarGridSpec(
            num_scalar_prefetch=0,
            grid=grid,
            in_specs=[pl.BlockSpec((tile_rows, lanes), lambda i: (i, 0))],
            out_specs=pl.BlockSpec((tile_rows, lanes), lambda i: (i, 0)),
        ),
        compiler_params=pltpu.CompilerParams(
            # Shards grid steps across both TensorCores on v7x; harmless elsewhere.
            dimension_semantics=("parallel",),
        ),
    )(x2d)


def swish(x: jax.Array) -> jax.Array:
    """Elementwise Swish/SiLU via Pallas. Same shape/dtype as input."""
    orig_shape = x.shape
    orig_dtype = x.dtype
    n = x.size
    if n == 0:
        return x

    itemsize = jnp.dtype(orig_dtype).itemsize
    sublane_g = max(8, 32 // max(itemsize, 1))  # 8 f32, 16 bf16/f16, 32 for 1-byte dtypes
    target_block_bytes, min_grid, f32_required = _device_tuning()
    if (not f32_required) and orig_dtype == jnp.bfloat16:
        compute_dtype = jnp.bfloat16   # native bf16 VPU/EUP path on v6e/v7x
    else:
        compute_dtype = jnp.float32

    x_flat = jnp.reshape(x, (-1,))

    plan = _exact_plan(n, itemsize, sublane_g, target_block_bytes, min_grid)
    if plan is not None:
        rows, lanes, tile_rows = plan
        out2d = _run_pallas(
            jnp.reshape(x_flat, (rows, lanes)), rows, lanes, tile_rows,
            compute_dtype, orig_dtype)
        return jnp.reshape(out2d, orig_shape)

    # Ragged flat size: kernel over the largest aligned prefix, short tail via
    # plain fused jnp -- avoids the old pad + slice HBM round trip.
    prefix, rows, lanes, tile_rows = _fallback_plan(
        n, itemsize, sublane_g, target_block_bytes)
    if prefix == 0:
        xf = x_flat.astype(compute_dtype)
        return jnp.reshape((xf * jax.nn.sigmoid(xf)).astype(orig_dtype), orig_shape)

    head = jnp.reshape(x_flat[:prefix], (rows, lanes))
    out_head = jnp.reshape(
        _run_pallas(head, rows, lanes, tile_rows, compute_dtype, orig_dtype), (-1,))
    tail = x_flat[prefix:].astype(compute_dtype)
    out_tail = (tail * jax.nn.sigmoid(tail)).astype(orig_dtype)
    return jnp.reshape(jnp.concatenate([out_head, out_tail]), orig_shape)


if __name__ == "__main__":
    key = jax.random.PRNGKey(0)

    # NCHW, matching the PyTorch module's typical use.
    x = jax.random.normal(key, (2, 4, 16, 16), dtype=jnp.float32)
    y = jax.block_until_ready(swish(x))
    y_ref = x * jax.nn.sigmoid(x)
    assert y.shape == x.shape and y.dtype == x.dtype
    assert jnp.max(jnp.abs(y - y_ref)) < 1e-5

    # Ragged flat size -> aligned-prefix kernel + fused-jnp tail path.
    x2 = jax.random.normal(jax.random.PRNGKey(1), (3, 17, 129), dtype=jnp.float32)
    y2 = jax.block_until_ready(swish(x2))
    y2_ref = x2 * jax.nn.sigmoid(x2)
    assert y2.shape == x2.shape and jnp.max(jnp.abs(y2 - y2_ref)) < 1e-5

    # bf16 path (native bf16 compute on v6e/v7x, f32 compute on older chips).
    x3 = jax.random.normal(jax.random.PRNGKey(2), (2, 4, 16, 16), dtype=jnp.bfloat16)
    y3 = jax.block_until_ready(swish(x3))
    x3f = x3.astype(jnp.float32)
    y3_ref = x3f * jax.nn.sigmoid(x3f)
    assert y3.shape == x3.shape and y3.dtype == jnp.bfloat16
    assert jnp.max(jnp.abs(y3.astype(jnp.float32) - y3_ref)) < 0.1

    print("KERNEL_OK")
</pallas_src>

<mosaic_0001>
module attributes {stable_mosaic.version = 11 : i64} {
  func.func @_swish_kernel(%arg0: i32, %arg1: memref<8x256xf32, #tpu.memory_space<vmem>>, %arg2: memref<8x256xf32, #tpu.memory_space<vmem>>) attributes {dimension_semantics = [#tpu.dimension_semantics<parallel>], iteration_bounds = array<i64: 1>, scalar_prefetch = 0 : i64, scratch_operands = 0 : i64, tpu.core_type = #tpu.core_type<tc>, window_params = [{transform_indices = @transform_0, window_bounds = array<i64: 8, 256>}, {transform_indices = @transform_1, window_bounds = array<i64: 8, 256>}]} {
    %c0 = arith.constant 0 : index
    %c0_0 = arith.constant 0 : index
    %0 = vector.load %arg1[%c0, %c0_0] : memref<8x256xf32, #tpu.memory_space<vmem>>, vector<8x256xf32>
    %cst = arith.constant 5.000000e-01 : f32
    %1 = vector.broadcast %cst : f32 to vector<8x256xf32>
    %2 = arith.mulf %0, %1 : vector<8x256xf32>
    %3 = math.tanh %2 : vector<8x256xf32>
    %cst_1 = arith.constant 5.000000e-01 : f32
    %4 = vector.broadcast %cst_1 : f32 to vector<8x256xf32>
    %5 = arith.mulf %3, %4 : vector<8x256xf32>
    %cst_2 = arith.constant 5.000000e-01 : f32
    %6 = vector.broadcast %cst_2 : f32 to vector<8x256xf32>
    %7 = arith.addf %5, %6 : vector<8x256xf32>
    %8 = arith.mulf %0, %7 : vector<8x256xf32>
    %c0_3 = arith.constant 0 : index
    %c0_4 = arith.constant 0 : index
    %9 = vector.load %arg2[%c0_3, %c0_4] : memref<8x256xf32, #tpu.memory_space<vmem>>, vector<8x256xf32>
    tpu.vector_store %arg2[%c0_3, %c0_4], %8 {strides = array<i32>} : memref<8x256xf32, #tpu.memory_space<vmem>>, vector<8x256xf32>,
    return
  }
  func.func @transform_0(%arg0: i32) -> (i32, i32) {
    %c0_i32 = arith.constant 0 : i32
    %c0_i32_0 = arith.constant 0 : i32
    return %arg0, %c0_i32 : i32, i32
  }
  func.func @transform_1(%arg0: i32) -> (i32, i32) {
    %c0_i32 = arith.constant 0 : i32
    %c0_i32_0 = arith.constant 0 : i32
    return %arg0, %c0_i32 : i32, i32
  }
}

</mosaic_0001>

<bundles_post_ra>
// kernel: tpu_custom_call.1
= control target key start
LH: loop header
LB: loop body
LE: loop exit
PB: predicated region body
PF: predicated region fallthrough
CT: control target
= control target key end

     0   :  { %6 = vsyncpa [#allocation3], 0  ;;  %s118_s0 = inlined_call_operand.hbm [shape: f32[8,256], index: 0, kind: input, shape index: {}]   ;;  %s119_s1 = inlined_call_operand.hbm [shape: f32[8,256], index: 1, kind: output, shape index: {}]  }
   0x1   :  { %7 = vsyncpa [#allocation4], 0  ;;  %s100_s6 = smov [#allocation2]  }
   0x2   :  { %s14_s7 = sshll.u32 %s100_s6, 4  ;;  %s15_s7 = int_to_ptr.vmem [resolvable:$true] %s14_s7 }
   0x3   :  { %s64_s8 = scalar_lea.vmem %s15_s7, 256  ;;  %p69_p1 = scmp.lt.s32.totalorder %s15_s7, %s15_s7 }
   0x4   :  { %p65_p0 = scmp.ne.s32.totalorder %s15_s7, %s64_s8  ;;  %p70_p2 = scmp.lt.s32.totalorder %s64_s8, %s64_s8 }
   0x6   :  { %p71_p3 = por %p70_p2, %p69_p1 }
   0x8   :  { %p72_p4 = pnand %p71_p3, %p65_p0 }
   0xa   :  { %75 = shalt.err (!%p72_p4)
}
   0xb   :  { %17 = dma.hbm_to_vmem [thread:$0]  %s118_s0, 256, %s15_s7, [#allocation3]  }
   0xc   :  { %96 = dma.done.wait [#allocation3], 256  }
   0xd   :  { %97 = vsyncadd [#allocation3], 4294967040  ;;  %v21_v0 = vld [vmem:[#allocation2] sm:$0xff]  ;;  %v22_v1 = vld [vmem:[#allocation2 + $0x8] sm:$0xff]  ;;  %s101_s11 = smov [#allocation5]  }
   0xe   :  { %v23_v2 = vmul.f32 0.5, %v21_v0  ;;  %v24_v3 = vmul.f32 0.5, %v22_v1  ;;  %s41_s12 = sshll.u32 %s101_s11, 4  ;;  %s42_s12 = int_to_ptr.vmem [resolvable:$true] %s41_s12 }
   0xf   :  { %s76_s0 = scalar_lea.vmem %s42_s12, 256  ;;  %p81_p6 = scmp.lt.s32.totalorder %s42_s12, %s42_s12 }
  0x10   :  { %52 = vtanh.f32 %v23_v2  ;;  %p77_p5 = scmp.ne.s32.totalorder %s42_s12, %s76_s0  ;;  %p82_p7 = scmp.lt.s32.totalorder %s76_s0, %s76_s0 }
  0x11   :  { %54 = vtanh.f32 %v24_v3 }
  0x12   :  { %p83_p8 = por %p82_p7, %p81_p6 }
  0x14   :  { %p84_p9 = pnand %p83_p8, %p77_p5 }
  0x1d   :  { %v53_v4 = vpop.eup %52 }
  0x1e   :  { %v55_v5 = vpop.eup %54  ;;  %v27_v6 = vmul.f32 0.5, %v53_v4 }
  0x1f   :  { %v28_v7 = vmul.f32 0.5, %v55_v5 }
  0x20   :  { %v29_v8 = vadd.f32 0.5, %v27_v6 }
  0x21   :  { %v30_v9 = vadd.f32 0.5, %v28_v7 }
  0x22   :  { %v31_v10 = vmul.f32 %v29_v8, %v21_v0 }
  0x23   :  { %v32_v11 = vmul.f32 %v30_v9, %v22_v1 }
  0x24   :  { %33 = vst [vmem:[#allocation5] sm:$0xff] %v31_v10 }
  0x25   :  { %34 = vst [vmem:[#allocation5 + $0x8] sm:$0xff] %v32_v11 }
  0x26   :  { %87 = shalt.err (!%p84_p9)
}
  0x27   :  { %44 = dma.vmem_to_hbm [thread:$0]  %s42_s12, 256, %s119_s1, [#allocation4]  }
  0x28   :  { %98 = dma.done.wait [#allocation4], 256  }
  0x29   :  { %99 = vsyncadd [#allocation4], 4294967040 }
  0x2a   :  { %48 = vsyncpa [#allocation3], 1 }
  0x2b   :  { %49 = vsyncpa [#allocation4], 1 }

</bundles_post_ra>
